<compile_context>
chip_gen: v7x
topology: tpu7x:2x2x1
jax: 0.10.0
libtpu: 0.0.40
codegen_flags: <defaults>
</compile_context>

<pallas_src>
import functools

import jax
import jax.numpy as jnp
from jax.experimental import pallas as pl
from jax.experimental.pallas import tpu as pltpu

PACK = 16            # original rows packed per kernel row: 16 * 8 features = 128 lanes
IN_F = 8
HID_F = 5
OUT_F = 2


def nested_model_kernel(x_ref, w_eff_ref, b_eff_ref, w4_ref, b4_ref, o_ref):
    # x_ref: (bt, 128) -- 16 original rows per kernel row, fully lane-dense.
    x = x_ref[...]

    # Fused Linear(8,3)->Linear(3,4)->Linear(4,5) as one block-diagonal MXU matmul, + ReLU.
    h = jnp.dot(x, w_eff_ref[...], preferred_element_type=jnp.float32)   # (bt, 80)
    h = jnp.maximum(h + b_eff_ref[...], 0.0)

    # Linear(5,2) (block-diagonal) + outer sigmoid; output (bt, 32) = 16 rows x 2 outputs.
    y = jnp.dot(h, w4_ref[...], preferred_element_type=jnp.float32)      # (bt, 32)
    o_ref[...] = jax.nn.sigmoid(y + b4_ref[...])


def _cdiv(a, b):
    return (a + b - 1) // b


def _round_up(n, m):
    return _cdiv(n, m) * m


@functools.partial(jax.jit, static_argnames=("block_rows",))
def nested_model_forward(x, params, *, block_rows=4096):
    """x: (B, 8) float32; params: weights stored as (in, out), biases (1, out)."""
    B = x.shape[0]
    w1, b1 = params["w1"], params["b1"]
    w2, b2 = params["w2"], params["b2"]
    w3, b3 = params["w3"], params["b3"]
    w4, b4 = params["w4"], params["b4"]

    # --- Algebraic fusion of the first three Linears (exact same math) ---
    w_eff = (w1 @ w2 @ w3).astype(jnp.float32)                 # (8, 5)
    b_eff = ((b1 @ w2 + b2) @ w3 + b3).astype(jnp.float32)     # (1, 5)

    # --- 16-way block-diagonal expansion (tiny, fuses into setup) ---
    eye = jnp.eye(PACK, dtype=jnp.float32)
    w_eff_bd = jnp.kron(eye, w_eff)                            # (128, 80)
    b_eff_bd = jnp.tile(b_eff, (1, PACK))                      # (1, 80)
    w4_bd = jnp.kron(eye, w4.astype(jnp.float32))              # (80, 32)
    b4_bd = jnp.tile(b4.astype(jnp.float32), (1, PACK))        # (1, 32)

    # --- Tile / grid selection (padding waste < 8*PACK rows per grid step) ---
    rows = _cdiv(B, PACK)                         # packed rows needed
    max_rows = max(8, _round_up(block_rows, 8))   # clamp tile to sublane multiple
    min_steps = 2 if rows >= 512 else 1           # keep both v7x TCs busy for big B
    n_steps = max(min_steps, _cdiv(rows, max_rows))
    if n_steps > 1 and n_steps % 2:
        n_steps += 1                              # even, balanced grid for megacore
    bt = _round_up(_cdiv(rows, n_steps), 8)
    rows_p = n_steps * bt
    b_pad = rows_p * PACK

    # Row-pad (no-op when B already aligned), then a FREE reshape (B,8)->(rows,128).
    # TODO(synk): for huge ragged B the row pad is one extra copy of x; handle the
    # remainder tile in-kernel instead if that ever matters.
    x_p = jnp.pad(x.astype(jnp.float32), ((0, b_pad - B), (0, 0)))
    x_packed = x_p.reshape(rows_p, PACK * IN_F)

    # Double-buffered input tile + (lane-padded) output tile + resident weights.
    vmem_need = 4 * bt * 128 * 4 + (128 * 80 + 80 * 32 + 80 + 32) * 4
    vmem_limit = int(min(64 * 1024 * 1024, max(16 * 1024 * 1024, 2 * vmem_need)))

    cost = pl.CostEstimate(
        flops=2 * rows_p * (128 * 80 + 80 * 32),
        transcendentals=rows_p * PACK * OUT_F,
        bytes_accessed=rows_p * (PACK * IN_F + PACK * OUT_F) * 4,
    )

    out_packed = pl.pallas_call(
        nested_model_kernel,
        out_shape=jax.ShapeDtypeStruct((rows_p, PACK * OUT_F), jnp.float32),
        grid=(n_steps,),
        in_specs=[
            pl.BlockSpec((bt, PACK * IN_F), lambda i: (i, 0)),            # x tile (streamed)
            pl.BlockSpec((PACK * IN_F, PACK * HID_F), lambda i: (0, 0)),  # Weff_bd (resident)
            pl.BlockSpec((1, PACK * HID_F), lambda i: (0, 0)),            # beff_bd
            pl.BlockSpec((PACK * HID_F, PACK * OUT_F), lambda i: (0, 0)), # W4_bd
            pl.BlockSpec((1, PACK * OUT_F), lambda i: (0, 0)),            # b4_bd
        ],
        out_specs=pl.BlockSpec((bt, PACK * OUT_F), lambda i: (i, 0)),
        compiler_params=pltpu.CompilerParams(
            dimension_semantics=("parallel",),     # shard batch grid on v7x megacore
            vmem_limit_bytes=vmem_limit,
        ),
        cost_estimate=cost,
    )(x_packed, w_eff_bd, b_eff_bd, w4_bd, b4_bd)

    # FREE reshape back to (b_pad, 2), then drop padded rows.
    return out_packed.reshape(b_pad, OUT_F)[:B]


def init_params(key):
    """Deterministic init matching the PyTorch module's layer shapes."""
    dims = [(8, 3), (3, 4), (4, 5), (5, 2)]
    params = {}
    for i, (fan_in, fan_out) in enumerate(dims, start=1):
        key, kw, kb = jax.random.split(key, 3)
        bound = 1.0 / jnp.sqrt(fan_in)
        params[f"w{i}"] = jax.random.uniform(
            kw, (fan_in, fan_out), jnp.float32, -bound, bound)
        params[f"b{i}"] = jax.random.uniform(
            kb, (1, fan_out), jnp.float32, -bound, bound)
    return params


def reference_forward(x, params):
    h = x @ params["w1"] + params["b1"]
    h = h @ params["w2"] + params["b2"]
    h = h @ params["w3"] + params["b3"]
    h = jnp.maximum(h, 0.0)
    h = h @ params["w4"] + params["b4"]
    return jax.nn.sigmoid(h)


if __name__ == "__main__":
    key = jax.random.PRNGKey(0)
    key, kx = jax.random.split(key)

    B = 300  # ragged on purpose: exercises row padding + free packed reshape
    x = jax.random.normal(kx, (B, 8), jnp.float32)
    params = init_params(key)

    ref = reference_forward(x, params)

    # Tiny tile -> even multi-step grid (tests tiling / pipelining / balance path).
    out = jax.block_until_ready(nested_model_forward(x, params, block_rows=8))
    assert out.shape == (B, 2)
    assert jnp.allclose(out, ref, atol=1e-5, rtol=1e-5)

    # Default (large) tile -> single-step path.
    out2 = jax.block_until_ready(nested_model_forward(x, params))
    assert jnp.allclose(out2, ref, atol=1e-5, rtol=1e-5)

    print("KERNEL_OK")
</pallas_src>

<mosaic_0001>
module attributes {stable_mosaic.version = 11 : i64} {
  func.func @nested_model_kernel(%arg0: i32, %arg1: memref<8x128xf32, #tpu.memory_space<vmem>>, %arg2: memref<128x80xf32, #tpu.memory_space<vmem>>, %arg3: memref<1x80xf32, #tpu.memory_space<vmem>>, %arg4: memref<80x32xf32, #tpu.memory_space<vmem>>, %arg5: memref<1x32xf32, #tpu.memory_space<vmem>>, %arg6: memref<8x32xf32, #tpu.memory_space<vmem>>) attributes {dimension_semantics = [#tpu.dimension_semantics<parallel>], iteration_bounds = array<i64: 4>, scalar_prefetch = 0 : i64, scratch_operands = 0 : i64, tpu.core_type = #tpu.core_type<tc>, window_params = [{transform_indices = @transform_0, window_bounds = array<i64: 8, 128>}, {pipeline_mode = #tpu.pipeline_mode<synchronous>, transform_indices = @transform_1, window_bounds = array<i64: 128, 80>}, {pipeline_mode = #tpu.pipeline_mode<synchronous>, transform_indices = @transform_2, window_bounds = array<i64: 1, 80>}, {pipeline_mode = #tpu.pipeline_mode<synchronous>, transform_indices = @transform_3, window_bounds = array<i64: 80, 32>}, {pipeline_mode = #tpu.pipeline_mode<synchronous>, transform_indices = @transform_4, window_bounds = array<i64: 1, 32>}, {transform_indices = @transform_5, window_bounds = array<i64: 8, 32>}]} {
    %c0 = arith.constant 0 : index
    %c0_0 = arith.constant 0 : index
    %0 = vector.load %arg1[%c0, %c0_0] : memref<8x128xf32, #tpu.memory_space<vmem>>, vector<8x128xf32>
    %c0_1 = arith.constant 0 : index
    %c0_2 = arith.constant 0 : index
    %1 = vector.load %arg2[%c0_1, %c0_2] : memref<128x80xf32, #tpu.memory_space<vmem>>, vector<128x80xf32>
    %cst = arith.constant dense<0.000000e+00> : vector<8x80xf32>
    %2 = tpu.matmul %0, %1, %cst {dimension_numbers = #tpu.dot_dimension_numbers<[1], [0], [0], [1], [0, 0, 1, 1], [], []>} : vector<8x128xf32>, vector<128x80xf32>, vector<8x80xf32> -> vector<8x80xf32>
    %c0_3 = arith.constant 0 : index
    %c0_4 = arith.constant 0 : index
    %3 = vector.load %arg3[%c0_3, %c0_4] : memref<1x80xf32, #tpu.memory_space<vmem>>, vector<1x80xf32>
    %4 = vector.broadcast %3 : vector<1x80xf32> to vector<8x80xf32>
    %5 = arith.addf %2, %4 : vector<8x80xf32>
    %cst_5 = arith.constant 0.000000e+00 : f32
    %6 = vector.broadcast %cst_5 : f32 to vector<8x80xf32>
    %7 = arith.maximumf %5, %6 : vector<8x80xf32>
    %c0_6 = arith.constant 0 : index
    %c0_7 = arith.constant 0 : index
    %8 = vector.load %arg4[%c0_6, %c0_7] : memref<80x32xf32, #tpu.memory_space<vmem>>, vector<80x32xf32>
    %cst_8 = arith.constant dense<0.000000e+00> : vector<8x32xf32>
    %9 = tpu.matmul %7, %8, %cst_8 {dimension_numbers = #tpu.dot_dimension_numbers<[1], [0], [0], [1], [0, 0, 1, 1], [], []>} : vector<8x80xf32>, vector<80x32xf32>, vector<8x32xf32> -> vector<8x32xf32>
    %c0_9 = arith.constant 0 : index
    %c0_10 = arith.constant 0 : index
    %10 = vector.load %arg5[%c0_9, %c0_10] : memref<1x32xf32, #tpu.memory_space<vmem>>, vector<1x32xf32>
    %11 = vector.broadcast %10 : vector<1x32xf32> to vector<8x32xf32>
    %12 = arith.addf %9, %11 : vector<8x32xf32>
    %13 = arith.negf %12 : vector<8x32xf32>
    %14 = math.exp %13 : vector<8x32xf32>
    %cst_11 = arith.constant 1.000000e+00 : f32
    %15 = vector.broadcast %cst_11 : f32 to vector<8x32xf32>
    %16 = arith.addf %15, %14 : vector<8x32xf32>
    %17 = arith.divf %15, %16 : vector<8x32xf32>
    %c0_12 = arith.constant 0 : index
    %c0_13 = arith.constant 0 : index
    %18 = vector.load %arg6[%c0_12, %c0_13] : memref<8x32xf32, #tpu.memory_space<vmem>>, vector<8x32xf32>
    tpu.vector_store %arg6[%c0_12, %c0_13], %17 {strides = array<i32>} : memref<8x32xf32, #tpu.memory_space<vmem>>, vector<8x32xf32>,
    return
  }
  func.func @transform_0(%arg0: i32) -> (i32, i32) {
    %c0_i32 = arith.constant 0 : i32
    %c0_i32_0 = arith.constant 0 : i32
    return %arg0, %c0_i32 : i32, i32
  }
  func.func @transform_1(%arg0: i32) -> (i32, i32) {
    %c0_i32 = arith.constant 0 : i32
    %c0_i32_0 = arith.constant 0 : i32
    %c0_i32_1 = arith.constant 0 : i32
    return %c0_i32, %c0_i32_0 : i32, i32
  }
  func.func @transform_2(%arg0: i32) -> (i32, i32) {
    %c0_i32 = arith.constant 0 : i32
    %c0_i32_0 = arith.constant 0 : i32
    %c0_i32_1 = arith.constant 0 : i32
    return %c0_i32, %c0_i32_0 : i32, i32
  }
  func.func @transform_3(%arg0: i32) -> (i32, i32) {
    %c0_i32 = arith.constant 0 : i32
    %c0_i32_0 = arith.constant 0 : i32
    %c0_i32_1 = arith.constant 0 : i32
    return %c0_i32, %c0_i32_0 : i32, i32
  }
  func.func @transform_4(%arg0: i32) -> (i32, i32) {
    %c0_i32 = arith.constant 0 : i32
    %c0_i32_0 = arith.constant 0 : i32
    %c0_i32_1 = arith.constant 0 : i32
    return %c0_i32, %c0_i32_0 : i32, i32
  }
  func.func @transform_5(%arg0: i32) -> (i32, i32) {
    %c0_i32 = arith.constant 0 : i32
    %c0_i32_0 = arith.constant 0 : i32
    return %arg0, %c0_i32 : i32, i32
  }
}

</mosaic_0001>

<bundles_post_ra>
// kernel: nested_model_forward.1
= control target key start
LH: loop header
LB: loop body
LE: loop exit
PB: predicated region body
PF: predicated region fallthrough
CT: control target
= control target key end

     0   :  { %s661_s18 = smov 0   ;;  %s782_s0 = inlined_call_operand.vmem [shape: f32[32,128], index: 0, kind: input, shape index: {}]   ;;  %s783_s1 = inlined_call_operand.vmem [shape: f32[128,80], index: 1, kind: input, shape index: {}]   ;;  %s784_s2 = inlined_call_operand.vmem [shape: f32[1,80], index: 2, kind: input, shape index: {}]   ;;  %s785_s3 = inlined_call_operand.vmem [shape: f32[80,32], index: 3, kind: input, shape index: {}]   ;;  %s786_s4 = inlined_call_operand.vmem [shape: f32[1,32], index: 4, kind: input, shape index: {}]   ;;  %s787_s5 = inlined_call_operand.vmem [shape: f32[32,32], index: 5, kind: output, shape index: {}]  }
   0x1 LB: > { %s467_s19 = sadd.s32 4294967295, %s626_s18   ;;  %p471_p0 = scmp.ge.s32.totalorder %s626_s18, 1  ;;  %s626_s18 = sphi %s661_s18, %s15_s18  }
   0x2   : > { %p186_p1 = scmp.lt.s32.totalorder %s626_s18, 5 }
   0x4   : > { %p187_p2 = pnand %p471_p0, %p186_p1 }
   0x5   : > { %v221_v0 = vld [vmem:[%s783_s1] sm:$0xff] (!%p187_p2)  ;;  %v222_v1 = vld [vmem:[%s783_s1 + $0x8] sm:$0xff] (!%p187_p2)  ;;  %v223_v2 = vld [vmem:[%s783_s1 + $0x10] sm:$0xff] (!%p187_p2)  ;;  %v628_v3 = vmov (!%p187_p2), 0.0|0.0   ;;  %vm629_vm0 = vmmov (!%p187_p2), 0   ;;  %v630_v6 = vmov (!%p187_p2), 0.0  }
   0x6   : > { %190 = sbr.rel (%p187_p2) target bundleno = 496 (0x1f0), region = 40  ;;  %566 = vmatprep.subr.bf16.mxu0 (!%p187_p2), %v628_v3  ;;  %v567_v4 = vpack.c.bf16 (!%p187_p2), %v222_v1, %v221_v0  ;;  %v224_v5 = vld [vmem:[%s783_s1 + $0x18] sm:$0xff] (!%p187_p2)  ;;  %540 = vmatprep.mubr.msk.f32.mxu0 (!%p187_p2), %vm629_vm0, %v630_v6  ;;  %v225_v8 = vld [vmem:[%s783_s1 + $0x20] sm:$0xff] (!%p187_p2)  ;;  %v226_v9 = vld [vmem:[%s783_s1 + $0x28] sm:$0xff] (!%p187_p2)  ;;  %p212_p3 = scmp.lt.s32.totalorder (!%p187_p2), %s467_s19, 3  ;;  %vm332_vm1 = vcmask (!%p187_p2), 654336  }
   0x7   : > { %590 = vmatprep.subr.bf16.mxu1 (!%p187_p2), %v628_v3  ;;  %563 = vmatprep.mubr.msk.f32.mxu1 (!%p187_p2), %vm629_vm0, %v630_v6  ;;  %v570_v7 = vpack.c.bf16 (!%p187_p2), %v224_v5, %v223_v2  ;;  %v315_v10 = vld [vmem:[%s785_s3] sm:$0xff] (!%p187_p2)  ;;  %v316_v11 = vld [vmem:[%s785_s3 + $0x8] sm:$0xff] (!%p187_p2)  ;;  %v317_v13 = vld [vmem:[%s785_s3 + $0x10] sm:$0xff] (!%p187_p2)  ;;  %v573_v15 = vpack.c.bf16 (!%p187_p2), %v226_v9, %v225_v8  ;;  %vm412_vm2 = vcmask (!%p187_p2), 261120  }
   0x8   : > { %568 = vmatpush3.bf16.msra.mxu0 (!%p187_p2), %v567_v4  ;;  %v591_v12 = vpack.c.bf16 (!%p187_p2), %v316_v11, %v315_v10  ;;  %v318_v14 = vld [vmem:[%s785_s3 + $0x18] sm:$0xff] (!%p187_p2)  ;;  %v227_v16 = vld [vmem:[%s783_s1 + $0x30] sm:$0xff] (!%p187_p2)  ;;  %v319_v19 = vld [vmem:[%s785_s3 + $0x20] sm:$0xff] (!%p187_p2) }
   0x9   : > { %569 = vmatprep.subr.bf16.mxu0 (!%p187_p2), %v628_v3  ;;  %v228_v17 = vld [vmem:[%s783_s1 + $0x38] sm:$0xff] (!%p187_p2)  ;;  %v594_v18 = vpack.c.bf16 (!%p187_p2), %v318_v14, %v317_v13  ;;  %v320_v20 = vld [vmem:[%s785_s3 + $0x28] sm:$0xff] (!%p187_p2)  ;;  %v229_v22 = vld [vmem:[%s783_s1 + $0x40] sm:$0xff] (!%p187_p2) }
   0xa   : > { %592 = vmatpush3.bf16.msra.mxu1 (!%p187_p2), %v591_v12  ;;  %v576_v21 = vpack.c.bf16 (!%p187_p2), %v228_v17, %v227_v16  ;;  %v230_v23 = vld [vmem:[%s783_s1 + $0x48] sm:$0xff] (!%p187_p2)  ;;  %v597_v24 = vpack.c.bf16 (!%p187_p2), %v320_v20, %v319_v19  ;;  %v321_v25 = vld [vmem:[%s785_s3 + $0x30] sm:$0xff] (!%p187_p2)  ;;  %v322_v26 = vld [vmem:[%s785_s3 + $0x38] sm:$0xff] (!%p187_p2) }
   0xb   : > { %593 = vmatprep.subr.bf16.mxu1 (!%p187_p2), %v628_v3  ;;  %v579_v27 = vpack.c.bf16 (!%p187_p2), %v230_v23, %v229_v22  ;;  %v231_v28 = vld [vmem:[%s783_s1 + $0x50] sm:$0xff] (!%p187_p2)  ;;  %v232_v29 = vld [vmem:[%s783_s1 + $0x58] sm:$0xff] (!%p187_p2)  ;;  %v600_v30 = vpack.c.bf16 (!%p187_p2), %v322_v26, %v321_v25  ;;  %v233_v32 = vld [vmem:[%s783_s1 + $0x60] sm:$0xff] (!%p187_p2) }
   0xc   : > { %571 = vmatpush3.bf16.msra.mxu0 (!%p187_p2), %v570_v7  ;;  %v582_v31 = vpack.c.bf16 (!%p187_p2), %v232_v29, %v231_v28  ;;  %v234_v33 = vld [vmem:[%s783_s1 + $0x68] sm:$0xff] (!%p187_p2)  ;;  %v235_v35 = vld [vmem:[%s783_s1 + $0x70] sm:$0xff] (!%p187_p2)  ;;  %v236_v36 = vld [vmem:[%s783_s1 + $0x78] sm:$0xff] (!%p187_p2) }
   0xd   : > { %572 = vmatprep.subr.bf16.mxu0 %v628_v3  ;;  %s789_s19 = smov (!%p212_p3, %s467_s19), 3  ;;  %v585_v34 = vpack.c.bf16 %v234_v33, %v233_v32  ;;  %v588_v37 = vpack.c.bf16 %v236_v36, %v235_v35  ;;  %v323_v39 = vld [vmem:[%s785_s3 + $0x40] sm:$0xff]  ;;  %v324_v40 = vld [vmem:[%s785_s3 + $0x48] sm:$0xff] }
   0xe   : > { %595 = vmatpush3.bf16.msra.mxu1 %v594_v18  ;;  %s472_s22 = sshll.u32 %s789_s19, 3  ;;  %v603_v41 = vpack.c.bf16 %v324_v40, %v323_v39  ;;  %v474_v42 = vld [vmem:[%s784_s2] ss:$0 sm:$0xff] }
   0xf   : > { %596 = vmatprep.subr.bf16.mxu1 %v628_v3  ;;  %s215_s25 = scalar_lea.vmem %s782_s0, %s472_s22  ;;  %v475_v47 = vld [vmem:[%s786_s4] ss:$0 sm:$0xff]  ;;  %s219_s10 = scalar_lea.vmem %s787_s5, %s472_s22 }
  0x10   : > { %574 = vmatpush3.bf16.msra.mxu0 %v573_v15  ;;  %v220_v38 = vld [vmem:[%s215_s25] sm:$0xff] }
  0x11   : > { %575 = vmatprep.subr.bf16.mxu0 %v628_v3 }
  0x12   : > { %598 = vmatpush3.bf16.msra.mxu1 %v597_v24 }
  0x13   : > { %599 = vmatprep.subr.bf16.mxu1 %v628_v3 }
  0x14   : > { %577 = vmatpush3.bf16.msra.mxu0 %v576_v21 }
  0x15   : > { %578 = vmatprep.subr.bf16.mxu0 %v628_v3 }
  0x16   : > { %601 = vmatpush3.bf16.msra.mxu1 %v600_v30 }
  0x17   : > { %602 = vmatprep.subr.bf16.mxu1 %v628_v3 }
  0x18   : > { %580 = vmatpush3.bf16.msra.mxu0 %v579_v27 }
  0x19   : > { %581 = vmatprep.subr.bf16.mxu0 %v628_v3 }
  0x1a   : > { %604 = vmatpush3.bf16.msra.mxu1 %v603_v41 }
  0x1c   : > { %583 = vmatpush3.bf16.msra.mxu0 %v582_v31 }
  0x1d   : > { %584 = vmatprep.subr.bf16.mxu0 %v628_v3 }
  0x20   : > { %586 = vmatpush3.bf16.msra.mxu0 %v585_v34 }
  0x21   : > { %587 = vmatprep.subr.bf16.mxu0 %v628_v3 }
  0x24   : > { %589 = vmatpush3.bf16.msra.mxu0 %v588_v37 }
  0x27   : > { %541 = vmatmul.mubr.f32.vlgmr.msra.gmra.mrb[0].mxu0 %v220_v38 }
  0xfa   : > { %v310_v43 = vpop.f32.mrb[0].mxu0 }
  0xfb   : > { %v311_v44 = vadd.f32 %v474_v42, %v310_v43  ;;  %v542_v45 = vpop.f32.mrb[1].mxu0 }
  0xfd   : > { %v314_v46 = vmax.f32 %v311_v44, 0.0 }
  0xff   : > { %564 = vmatmul.mubr.msk.f32.vlgmr.msra.gmra.mrb[0].mxu1 %vm332_vm1, %v314_v46 }
 0x1d2   : > { %v402_v48 = vpop.f32.mrb[0].mxu1 }
 0x1d3   : > { %v403_v49 = vadd.f32 %v475_v47, %v402_v48  ;;  %v565_v50 = vpop.f32.mrb[1].mxu1 }
 0x1d5   : > { %v477_v51 = vmul.f32 -1.442695, %v403_v49 }
 0x1d7   : > { %616 = vpow2.f32 %v477_v51 }
 0x1e1   : > { %v617_v52 = vpop.eup %616 }
 0x1e2   : > { %v409_v53 = vadd.f32 1.0, %v617_v52 }
 0x1e4   : > { %618 = vrcp.f32 %v409_v53 }
 0x1ee   : > { %v619_v54 = vpop.eup %618 }
 0x1ef   : > { %413 = vst.msk [vmem:[%s219_s10] sm:$0xff] %vm412_vm2, %v619_v54 }
 0x1f0 PF: > { %s15_s18 = sadd.s32 1, %s626_s18  }
 0x1f1   : > { %p12_p4 = scmp.ge.s32.totalorder %s15_s18, 6  }
 0x1f3   :  { %14 = sbr.rel (!%p12_p4) target bundleno = 1 (0x1), region = 70 }

</bundles_post_ra>
